<compile_context>
chip_gen: v7x
topology: tpu7x:2x2x1
jax: 0.10.0
libtpu: 0.0.40
codegen_flags: <defaults>
</compile_context>

<pallas_src>
import functools

import jax
import jax.numpy as jnp
from jax.experimental import pallas as pl
from jax.experimental.pallas import tpu as pltpu

_LANES = 128
_MiB = 1024 * 1024


# --------------------------------------------------------------------------- #
# Plain-JAX reference (mirrors the PyTorch module); also the tiny-input path.  #
# --------------------------------------------------------------------------- #
def _reference(mu1, logvar1, mu2, logvar2):
    def gaussian_kl(mu_q, logvar_q, mu_p, logvar_p):
        numerator = jnp.exp(logvar_q) + (mu_q - mu_p) ** 2
        fraction = numerator / jnp.exp(logvar_p)
        kl = 0.5 * jnp.sum(logvar_p - logvar_q + fraction - 1.0, axis=1)
        return jnp.mean(kl, axis=0)

    mean_mu = (mu1 + mu2) / 2
    mean_logvar = jnp.log((jnp.exp(logvar1) + jnp.exp(logvar2)) / 2)
    loss = gaussian_kl(mu1, logvar1, mean_mu, mean_logvar)
    loss = loss + gaussian_kl(mu2, logvar2, mean_mu, mean_logvar)
    return 0.5 * loss


# --------------------------------------------------------------------------- #
# Hardware introspection (defensive: never fails, falls back to safe values).  #
# --------------------------------------------------------------------------- #
def _vmem_capacity_bytes():
    try:
        info = pltpu.get_tpu_info()
        cap = getattr(info, "vmem_capacity_bytes", None)
        if cap:
            return int(cap)
    except Exception:
        pass
    return 64 * _MiB  # conservative (v7x-sized) default


def _tensorcores_per_chip():
    try:
        dev = jax.devices()[0]
        if dev.platform != "tpu":
            return 1
        kind = str(getattr(dev, "device_kind", "")).lower()
        if "v7" in kind:  # v7x: 2 TensorCores per chip
            return 2
    except Exception:
        pass
    return 1  # v5e / v6e: single TensorCore


# --------------------------------------------------------------------------- #
# Kernel                                                                       #
# --------------------------------------------------------------------------- #
def _gjsd_kernel(mu1_ref, lv1_ref, mu2_ref, lv2_ref, out_ref, *,
                 tile_rows, valid_rows, t_per_core, first_masked_tile, needs_mask):
    c = pl.program_id(0)   # core-split axis (size 1 on single-TC chips)
    t = pl.program_id(1)   # tile-reduction axis ("arbitrary")

    @pl.when(t == 0)
    def _():
        out_ref[...] = jnp.zeros_like(out_ref)

    mu1 = mu1_ref[...].astype(jnp.float32)
    lv1 = lv1_ref[...].astype(jnp.float32)
    mu2 = mu2_ref[...].astype(jnp.float32)
    lv2 = lv2_ref[...].astype(jnp.float32)

    # Fused integrand of KL(1||m)+KL(2||m), overflow-safe, no VALU divide:
    #   mean_logvar = max(lv1,lv2) + log(0.5*(1+exp(-|lv1-lv2|)))  (= log mean_var)
    #   term = 2*mean_logvar - lv1 - lv2 + (mu1-mu2)^2 * 0.5 * exp(-mean_logvar)
    #        = |lv1-lv2| + 2*log_t + (mu1-mu2)^2 * 0.5 * exp(-(mx + log_t))
    diff = mu1 - mu2
    mx = jnp.maximum(lv1, lv2)
    d = jnp.abs(lv1 - lv2)
    log_t = jnp.log(0.5 * (1.0 + jnp.exp(-d)))   # EUP: exp + log
    inv_mean_var = jnp.exp(-(mx + log_t))        # EUP: exp (replaces the f32 divide)
    term = d + 2.0 * log_t + (diff * diff) * (0.5 * inv_mean_var)

    def accum(x):
        # (tile_rows,128) -> (8,128): sum whole f32 vregs on the VPU.  No XLU
        # cross-lane reduce and no scalar read-modify-write per step.
        out_ref[...] += x.reshape(tile_rows // 8, 8, _LANES).sum(axis=0)

    if needs_mask:
        nominal = c * t_per_core + t             # unclamped global tile index

        @pl.when(nominal < first_masked_tile)    # full tiles: no mask cost at all
        def _():
            accum(term)

        @pl.when(nominal >= first_masked_tile)   # tail / overflow tiles only
        def _():
            rows = nominal * tile_rows + jax.lax.broadcasted_iota(
                jnp.int32, term.shape, 0)
            accum(jnp.where(rows < valid_rows, term, 0.0))
    else:
        accum(term)


# --------------------------------------------------------------------------- #
# Wrapper                                                                      #
# --------------------------------------------------------------------------- #
def gaussian_js_div_loss(mu1, logvar1, mu2, logvar2, *,
                         block_rows=None, min_pallas_bytes=1 * _MiB):
    """JS divergence between two diagonal Gaussians (matches the PyTorch module).

    Pass ``min_pallas_bytes=0`` to force the Pallas kernel even for tiny inputs.
    """
    assert mu1.shape == logvar1.shape == mu2.shape == logvar2.shape
    assert mu1.ndim == 2, "module semantics assume (batch, hidden) inputs"
    B, D = mu1.shape
    N = B * D
    itemsize = jnp.dtype(mu1.dtype).itemsize

    # Tiny problems: pallas_call launch / padding overhead dominates -> plain jnp.
    if 4 * N * itemsize < min_pallas_bytes:
        return _reference(mu1, logvar1, mu2, logvar2)

    # ---- lane-dense layout ---------------------------------------------------
    # Flatten (B, D) -> (R, 128) so every lane of every vreg is used even when D
    # is narrow.  Zero padding of the flat tail contributes exactly 0 to the fused
    # term (lv=0 -> var=1 -> mean_logvar=0, diff=0), so it needs no extra mask.
    row_align = 8 if itemsize >= 4 else 16       # f32 (8,128) / bf16 (16,128) packing
    R = max(pl.cdiv(N, _LANES), row_align)
    total = R * _LANES
    flats = [x.reshape(-1) for x in (mu1, logvar1, mu2, logvar2)]
    if total != N:
        # TODO(synk): a fully copy-free tail would need a 1-D BlockSpec; this pad
        # copy only triggers when B*D is not a multiple of 128 (or is tiny).
        flats = [jnp.pad(f, (0, total - N)) for f in flats]
    mats = [f.reshape(R, _LANES) for f in flats]

    # ---- generation-aware tile sizing -----------------------------------------
    vmem_cap = _vmem_capacity_bytes()
    in_budget = min(48 * _MiB, (vmem_cap * 3) // 8)       # 128MiB->48MiB, 64MiB->24MiB
    vmem_limit = int(min(vmem_cap // 2, in_budget + 16 * _MiB))
    bytes_per_row = 4 * 2 * _LANES * itemsize             # 4 streams, double-buffered
    if block_rows is None:
        tb_req = max(row_align, in_budget // bytes_per_row)
    else:
        tb_req = max(1, int(block_rows))
    tb = max(row_align, (min(tb_req, R) // row_align) * row_align)
    n_tiles = pl.cdiv(R, tb)

    scale = 0.25 / B   # 0.5 (JS avg) * 0.5 (KL factor) * mean over batch

    def launch(n_cores):
        t_per_core = pl.cdiv(n_tiles, n_cores)
        needs_clamp = (n_cores * t_per_core) != n_tiles
        needs_mask = needs_clamp or (R % tb != 0)
        first_masked_tile = R // tb
        last_tile = n_tiles - 1

        if needs_clamp:
            def in_map(c, t):
                # Overflow steps (fully masked in-kernel) re-read an in-bounds tile.
                return (jnp.minimum(c * t_per_core + t, last_tile), 0)
        else:
            def in_map(c, t):
                return (c * t_per_core + t, 0)

        in_spec = pl.BlockSpec((tb, _LANES), in_map)
        out_spec = pl.BlockSpec((8, _LANES), lambda c, t: (c, 0))

        if n_cores > 1:
            core_sem = getattr(pltpu, "CORE_PARALLEL", "parallel")
        else:
            core_sem = "arbitrary"

        kernel = functools.partial(
            _gjsd_kernel, tile_rows=tb, valid_rows=R, t_per_core=t_per_core,
            first_masked_tile=first_masked_tile, needs_mask=needs_mask)

        partials = pl.pallas_call(
            kernel,
            out_shape=jax.ShapeDtypeStruct((n_cores * 8, _LANES), jnp.float32),
            grid_spec=pltpu.PrefetchScalarGridSpec(
                num_scalar_prefetch=0,
                grid=(n_cores, t_per_core),
                in_specs=[in_spec, in_spec, in_spec, in_spec],
                out_specs=out_spec,
            ),
            compiler_params=pltpu.CompilerParams(
                dimension_semantics=(core_sem, "arbitrary"),
                vmem_limit_bytes=vmem_limit,
            ),
        )(*mats)
        # Final tiny reduction + scaling in XLA (at most n_cores*8*128 floats).
        return jnp.sum(partials) * scale

    # v7x: shard the (HBM-bound) reduction over both TensorCores; fall back to a
    # plain single-core grid if the core-parallel lowering is unavailable.
    if _tensorcores_per_chip() > 1 and n_tiles >= 2:
        try:
            return launch(2)
        except Exception:
            pass
    return launch(1)


# --------------------------------------------------------------------------- #
# Demo / self-test                                                             #
# --------------------------------------------------------------------------- #
if __name__ == "__main__":
    def make(key, shape, dtype=jnp.float32):
        k1, k2, k3, k4 = jax.random.split(key, 4)
        mu1 = jax.random.normal(k1, shape, dtype=jnp.float32)
        lv1 = 0.5 * jax.random.normal(k2, shape, dtype=jnp.float32)
        mu2 = jax.random.normal(k3, shape, dtype=jnp.float32)
        lv2 = 0.5 * jax.random.normal(k4, shape, dtype=jnp.float32)
        return tuple(x.astype(dtype) for x in (mu1, lv1, mu2, lv2))

    keys = jax.random.split(jax.random.PRNGKey(0), 4)

    # 1) Module-spec shapes (batch=2, hidden=32); Pallas kernel forced.
    args = make(keys[0], (2, 32))
    loss = jax.block_until_ready(gaussian_js_div_loss(*args, min_pallas_bytes=0))
    ref = _reference(*args)
    assert jnp.allclose(loss, ref, rtol=1e-5, atol=1e-5), (loss, ref)

    # 2) Lane padding (B*D % 128 != 0) + partial last row tile (mask path),
    #    multi-tile accumulation.
    args = make(keys[1], (77, 48))
    loss = jax.block_until_ready(
        gaussian_js_div_loss(*args, block_rows=8, min_pallas_bytes=0))
    ref = _reference(*args)
    assert jnp.allclose(loss, ref, rtol=1e-4, atol=1e-5), (loss, ref)

    # 3) Exact multiple: no padding, no mask, several full tiles.
    args = make(keys[2], (64, 256))
    loss = jax.block_until_ready(
        gaussian_js_div_loss(*args, block_rows=16, min_pallas_bytes=0))
    ref = _reference(*args)
    assert jnp.allclose(loss, ref, rtol=1e-4, atol=1e-5), (loss, ref)

    # 4) bf16 inputs: tiles sized from the real dtype, (16,128)-aligned rows,
    #    bf16 kept through the DMA and cast to f32 in-kernel.
    args = make(keys[3], (48, 160), dtype=jnp.bfloat16)
    loss = jax.block_until_ready(gaussian_js_div_loss(*args, min_pallas_bytes=0))
    ref = _reference(*(x.astype(jnp.float32) for x in args))
    assert jnp.allclose(loss, ref, rtol=1e-4, atol=1e-4), (loss, ref)

    # 5) Tiny-problem default path (plain-jnp fallback).
    args = make(keys[0], (2, 32))
    loss = jax.block_until_ready(gaussian_js_div_loss(*args))
    ref = _reference(*args)
    assert jnp.allclose(loss, ref, rtol=1e-5, atol=1e-5), (loss, ref)

    print("KERNEL_OK")
</pallas_src>

<mosaic_0001>
module attributes {stable_mosaic.version = 11 : i64} {
  func.func @_gjsd_kernel(%arg0: i32, %arg1: i32, %arg2: memref<8x128xf32, #tpu.memory_space<vmem>>, %arg3: memref<8x128xf32, #tpu.memory_space<vmem>>, %arg4: memref<8x128xf32, #tpu.memory_space<vmem>>, %arg5: memref<8x128xf32, #tpu.memory_space<vmem>>, %arg6: memref<8x128xf32, #tpu.memory_space<vmem>>) attributes {dimension_semantics = [#tpu.dimension_semantics<arbitrary>, #tpu.dimension_semantics<arbitrary>], iteration_bounds = array<i64: 1, 1>, scalar_prefetch = 0 : i64, scratch_operands = 0 : i64, tpu.core_type = #tpu.core_type<tc>, window_params = [{transform_indices = @transform_0, window_bounds = array<i64: 8, 128>}, {transform_indices = @transform_1, window_bounds = array<i64: 8, 128>}, {transform_indices = @transform_2, window_bounds = array<i64: 8, 128>}, {transform_indices = @transform_3, window_bounds = array<i64: 8, 128>}, {transform_indices = @transform_4, window_bounds = array<i64: 8, 128>}]} {
    %c0_i32 = arith.constant 0 : i32
    %0 = arith.cmpi eq, %arg1, %c0_i32 : i32
    %1 = arith.extui %0 : i1 to i32
    %c0_i32_0 = arith.constant 0 : i32
    %2 = arith.cmpi ne, %1, %c0_i32_0 : i32
    scf.if %2 {
      %cst_18 = arith.constant 0.000000e+00 : f32
      %36 = vector.broadcast %cst_18 : f32 to vector<8x128xf32>
      %c0_19 = arith.constant 0 : index
      %c0_20 = arith.constant 0 : index
      %37 = vector.load %arg6[%c0_19, %c0_20] : memref<8x128xf32, #tpu.memory_space<vmem>>, vector<8x128xf32>
      tpu.vector_store %arg6[%c0_19, %c0_20], %36 {strides = array<i32>} : memref<8x128xf32, #tpu.memory_space<vmem>>, vector<8x128xf32>,
    } else {
    }
    %c0 = arith.constant 0 : index
    %c0_1 = arith.constant 0 : index
    %3 = vector.load %arg2[%c0, %c0_1] : memref<8x128xf32, #tpu.memory_space<vmem>>, vector<8x128xf32>
    %c0_2 = arith.constant 0 : index
    %c0_3 = arith.constant 0 : index
    %4 = vector.load %arg3[%c0_2, %c0_3] : memref<8x128xf32, #tpu.memory_space<vmem>>, vector<8x128xf32>
    %c0_4 = arith.constant 0 : index
    %c0_5 = arith.constant 0 : index
    %5 = vector.load %arg4[%c0_4, %c0_5] : memref<8x128xf32, #tpu.memory_space<vmem>>, vector<8x128xf32>
    %c0_6 = arith.constant 0 : index
    %c0_7 = arith.constant 0 : index
    %6 = vector.load %arg5[%c0_6, %c0_7] : memref<8x128xf32, #tpu.memory_space<vmem>>, vector<8x128xf32>
    %7 = arith.subf %3, %5 : vector<8x128xf32>
    %8 = arith.maximumf %4, %6 : vector<8x128xf32>
    %9 = arith.subf %4, %6 : vector<8x128xf32>
    %10 = math.absf %9 : vector<8x128xf32>
    %cst = arith.constant 0.000000e+00 : f32
    %11 = vector.broadcast %cst : f32 to vector<8x128xf32>
    %12 = arith.subf %11, %10 : vector<8x128xf32>
    %13 = math.exp %12 : vector<8x128xf32>
    %cst_8 = arith.constant 1.000000e+00 : f32
    %14 = vector.broadcast %cst_8 : f32 to vector<8x128xf32>
    %15 = arith.addf %14, %13 : vector<8x128xf32>
    %cst_9 = arith.constant 5.000000e-01 : f32
    %16 = vector.broadcast %cst_9 : f32 to vector<8x128xf32>
    %17 = arith.mulf %16, %15 : vector<8x128xf32>
    %18 = math.log %17 : vector<8x128xf32>
    %19 = arith.addf %8, %18 : vector<8x128xf32>
    %cst_10 = arith.constant 0.000000e+00 : f32
    %20 = vector.broadcast %cst_10 : f32 to vector<8x128xf32>
    %21 = arith.subf %20, %19 : vector<8x128xf32>
    %22 = math.exp %21 : vector<8x128xf32>
    %cst_11 = arith.constant 2.000000e+00 : f32
    %23 = vector.broadcast %cst_11 : f32 to vector<8x128xf32>
    %24 = arith.mulf %23, %18 : vector<8x128xf32>
    %25 = arith.addf %10, %24 : vector<8x128xf32>
    %26 = arith.mulf %7, %7 : vector<8x128xf32>
    %cst_12 = arith.constant 5.000000e-01 : f32
    %27 = vector.broadcast %cst_12 : f32 to vector<8x128xf32>
    %28 = arith.mulf %27, %22 : vector<8x128xf32>
    %29 = arith.mulf %26, %28 : vector<8x128xf32>
    %30 = arith.addf %25, %29 : vector<8x128xf32>
    %c0_13 = arith.constant 0 : index
    %c0_14 = arith.constant 0 : index
    %31 = vector.load %arg6[%c0_13, %c0_14] : memref<8x128xf32, #tpu.memory_space<vmem>>, vector<8x128xf32>
    %32 = vector.shape_cast %30 : vector<8x128xf32> to vector<1x8x128xf32>
    %cst_15 = arith.constant dense<0.000000e+00> : vector<8x128xf32>
    %33 = vector.multi_reduction <add>, %32, %cst_15 [0] : vector<1x8x128xf32> to vector<8x128xf32>
    %34 = arith.addf %31, %33 : vector<8x128xf32>
    %c0_16 = arith.constant 0 : index
    %c0_17 = arith.constant 0 : index
    %35 = vector.load %arg6[%c0_16, %c0_17] : memref<8x128xf32, #tpu.memory_space<vmem>>, vector<8x128xf32>
    tpu.vector_store %arg6[%c0_16, %c0_17], %34 {strides = array<i32>} : memref<8x128xf32, #tpu.memory_space<vmem>>, vector<8x128xf32>,
    return
  }
  func.func @transform_0(%arg0: i32, %arg1: i32) -> (i32, i32) {
    %c1_i32 = arith.constant 1 : i32
    %0 = arith.muli %arg0, %c1_i32 : i32
    %1 = arith.addi %0, %arg1 : i32
    %c0_i32 = arith.constant 0 : i32
    %c0_i32_0 = arith.constant 0 : i32
    return %1, %c0_i32 : i32, i32
  }
  func.func @transform_1(%arg0: i32, %arg1: i32) -> (i32, i32) {
    %c1_i32 = arith.constant 1 : i32
    %0 = arith.muli %arg0, %c1_i32 : i32
    %1 = arith.addi %0, %arg1 : i32
    %c0_i32 = arith.constant 0 : i32
    %c0_i32_0 = arith.constant 0 : i32
    return %1, %c0_i32 : i32, i32
  }
  func.func @transform_2(%arg0: i32, %arg1: i32) -> (i32, i32) {
    %c1_i32 = arith.constant 1 : i32
    %0 = arith.muli %arg0, %c1_i32 : i32
    %1 = arith.addi %0, %arg1 : i32
    %c0_i32 = arith.constant 0 : i32
    %c0_i32_0 = arith.constant 0 : i32
    return %1, %c0_i32 : i32, i32
  }
  func.func @transform_3(%arg0: i32, %arg1: i32) -> (i32, i32) {
    %c1_i32 = arith.constant 1 : i32
    %0 = arith.muli %arg0, %c1_i32 : i32
    %1 = arith.addi %0, %arg1 : i32
    %c0_i32 = arith.constant 0 : i32
    %c0_i32_0 = arith.constant 0 : i32
    return %1, %c0_i32 : i32, i32
  }
  func.func @transform_4(%arg0: i32, %arg1: i32) -> (i32, i32) {
    %c0_i32 = arith.constant 0 : i32
    %c0_i32_0 = arith.constant 0 : i32
    return %arg0, %c0_i32 : i32, i32
  }
}

</mosaic_0001>

<bundles_post_ra>
// kernel: tpu_custom_call.1
= control target key start
LH: loop header
LB: loop body
LE: loop exit
PB: predicated region body
PF: predicated region fallthrough
CT: control target
= control target key end

     0   :  { %9 = vsyncpa [#allocation3], 0  ;;  %s323_s0 = inlined_call_operand.hbm [shape: f32[8,128], index: 0, kind: input, shape index: {}]   ;;  %s324_s1 = inlined_call_operand.hbm [shape: f32[8,128], index: 1, kind: input, shape index: {}]   ;;  %s325_s2 = inlined_call_operand.hbm [shape: f32[8,128], index: 2, kind: input, shape index: {}]   ;;  %s326_s3 = inlined_call_operand.vmem [shape: f32[8,128], index: 3, kind: input, shape index: {}]   ;;  %s327_s4 = inlined_call_operand.hbm [shape: f32[8,128], index: 4, kind: output, shape index: {}]  }
   0x1   :  { %10 = vsyncpa [#allocation6], 0 }
   0x2   :  { %11 = vsyncpa [#allocation4], 0  ;;  %s243_s15 = smov [#allocation5]   ;;  %s244_s17 = smov [#allocation2]  }
   0x3   :  { %s34_s16 = sshll.u32 %s243_s15, 4  ;;  %s21_s18 = sshll.u32 %s244_s17, 4  ;;  %s35_s16 = int_to_ptr.vmem [resolvable:$true] %s34_s16  ;;  %s22_s18 = int_to_ptr.vmem [resolvable:$true] %s21_s18 }
   0x4   :  { %s149_s21 = scalar_lea.hbm %s324_s1, 128 }
   0x5   :  { %p150_p0 = scmp.ne.s32.totalorder %s324_s1, %s149_s21  ;;  %p153_p1 = scmp.lt.u32.totalorder %s149_s21, %s324_s1 }
   0x7   :  { %p155_p2 = pnand %p153_p1, %p150_p0 }
   0x9   :  { %158 = shalt.err (!%p155_p2)
}
   0xa   :  { %s159_s26 = scalar_lea.vmem %s35_s16, 128  ;;  %p164_p4 = scmp.lt.s32.totalorder %s35_s16, %s35_s16 }
   0xb   :  { %p160_p3 = scmp.ne.s32.totalorder %s35_s16, %s159_s26  ;;  %p165_p5 = scmp.lt.s32.totalorder %s159_s26, %s159_s26 }
   0xd   :  { %p166_p6 = por %p165_p5, %p164_p4 }
   0xf   :  { %p167_p7 = pnand %p166_p6, %p160_p3 }
  0x11   :  { %170 = shalt.err (!%p167_p7)
}
  0x12   :  { %37 = dma.hbm_to_vmem [thread:$0]  %s324_s1, 128, %s35_s16, [#allocation6]  }
  0x13   :  { %s171_s5 = scalar_lea.hbm %s323_s0, 128 }
  0x14   :  { %p172_p8 = scmp.ne.s32.totalorder %s323_s0, %s171_s5  ;;  %p175_p9 = scmp.lt.u32.totalorder %s171_s5, %s323_s0 }
  0x16   :  { %p177_p10 = pnand %p175_p9, %p172_p8 }
  0x18   :  { %180 = shalt.err (!%p177_p10)
}
  0x19   :  { %s181_s10 = scalar_lea.vmem %s22_s18, 128  ;;  %p186_p12 = scmp.lt.s32.totalorder %s22_s18, %s22_s18 }
  0x1a   :  { %p182_p11 = scmp.ne.s32.totalorder %s22_s18, %s181_s10  ;;  %p187_p13 = scmp.lt.s32.totalorder %s181_s10, %s181_s10 }
  0x1c   :  { %p188_p0 = por %p187_p13, %p186_p12 }
  0x1e   :  { %p189_p1 = pnand %p188_p0, %p182_p11 }
  0x20   :  { %192 = shalt.err (!%p189_p1)
}
  0x21   :  { %24 = dma.hbm_to_vmem [thread:$0]  %s323_s0, 128, %s22_s18, [#allocation3]  }
  0x22   :  { %s245_s12 = smov [#allocation7]   ;;  %s193_s16 = scalar_lea.hbm %s325_s2, 128 }
  0x23   :  { %s47_s13 = sshll.u32 %s245_s12, 4  ;;  %p194_p2 = scmp.ne.s32.totalorder %s325_s2, %s193_s16  ;;  %s48_s13 = int_to_ptr.vmem [resolvable:$true] %s47_s13 }
  0x24   :  { %p197_p3 = scmp.lt.u32.totalorder %s193_s16, %s325_s2 }
  0x26   :  { %p199_p4 = pnand %p197_p3, %p194_p2 }
  0x28   :  { %202 = shalt.err (!%p199_p4)
}
  0x29   :  { %s203_s22 = scalar_lea.vmem %s48_s13, 128  ;;  %p208_p6 = scmp.lt.s32.totalorder %s48_s13, %s48_s13 }
  0x2a   :  { %p204_p5 = scmp.ne.s32.totalorder %s48_s13, %s203_s22  ;;  %p209_p7 = scmp.lt.s32.totalorder %s203_s22, %s203_s22 }
  0x2c   :  { %p210_p8 = por %p209_p7, %p208_p6 }
  0x2e   :  { %p211_p9 = pnand %p210_p8, %p204_p5 }
  0x30   :  { %214 = shalt.err (!%p211_p9)
}
  0x31   :  { %50 = dma.hbm_to_vmem [thread:$0]  %s325_s2, 128, %s48_s13, [#allocation6]  }
  0x32   :  { %237 = dma.done.wait [#allocation3], 128  }
  0x33   :  { %238 = vsyncadd [#allocation3], 4294967168 }
  0x34   :  { %239 = dma.done.wait [#allocation6], 256  }
  0x35   :  { %240 = vsyncadd [#allocation6], 4294967040  ;;  %v88_v0 = vld [vmem:[#allocation5] sm:$0xff]  ;;  %v90_v1 = vld [vmem:[%s326_s3] sm:$0xff]  ;;  %s246_s2 = smov [#allocation8]  }
  0x36   :  { %v93_v2 = vsub.f32 %v88_v0, %v90_v1  ;;  %v92_v9 = vmax.f32 %v88_v0, %v90_v1  ;;  %v87_v15 = vld [vmem:[#allocation2] sm:$0xff]  ;;  %v89_v16 = vld [vmem:[#allocation7] sm:$0xff]  ;;  %s122_s3 = sshll.u32 %s246_s2, 4  ;;  %s123_s3 = int_to_ptr.vmem [resolvable:$true] %s122_s3 }
  0x37   :  { %v91_v17 = vsub.f32 %v87_v15, %v89_v16  ;;  %s215_s25 = scalar_lea.vmem %s123_s3, 128  ;;  %p220_p11 = scmp.lt.s32.totalorder %s123_s3, %s123_s3 }
  0x38   :  { %v94_v3 = vand.u32 2147483647, %v93_v2  ;;  %p216_p10 = scmp.ne.s32.totalorder %s123_s3, %s215_s25  ;;  %p221_p12 = scmp.lt.s32.totalorder %s215_s25, %s215_s25 }
  0x39   :  { %v108_v19 = vmul.f32 %v91_v17, %v91_v17 }
  0x3a   :  { %v95_v4 = vsub.f32 0.0, %v94_v3  ;;  %p222_p13 = por %p221_p12, %p220_p11 }
  0x3c   :  { %v96_v5 = vmul.f32 1.442695, %v95_v4  ;;  %p223_p0 = pnand %p222_p13, %p216_p10 }
  0x3e   :  { %143 = vpow2.f32 %v96_v5 }
  0x48   :  { %v144_v6 = vpop.eup %143 }
  0x49   :  { %v98_v7 = vadd.f32 1.0, %v144_v6 }
  0x4b   :  { %v99_v8 = vmul.f32 0.5, %v98_v7 }
  0x4d   :  { %145 = vlog2.f32 %v99_v8 }
  0x57   :  { %v146_v10 = vpop.eup %145 }
  0x58   :  { %v101_v11 = vmul.f32 0.6931472, %v146_v10 }
  0x5a   :  { %v102_v12 = vadd.f32 %v101_v11, %v92_v9  ;;  %v106_v18 = vmul.f32 2.0, %v101_v11 }
  0x5c   :  { %v103_v13 = vsub.f32 0.0, %v102_v12  ;;  %v107_v21 = vadd.f32 %v106_v18, %v94_v3 }
  0x5e   :  { %v104_v14 = vmul.f32 1.442695, %v103_v13 }
  0x60   :  { %147 = vpow2.f32 %v104_v14 }
  0x6a   :  { %v148_v20 = vpop.eup %147 }
  0x6b   :  { %v109_v22 = vmul.f32 0.5, %v148_v20 }
  0x6d   :  { %v110_v23 = vmul.f32 %v109_v22, %v108_v19 }
  0x6f   :  { %v111_v24 = vadd.f32 %v110_v23, %v107_v21 }
  0x71   :  { %115 = vst [vmem:[#allocation8] sm:$0xff] %v111_v24 }
  0x72   :  { %226 = shalt.err (!%p223_p0)
}
  0x73   :  { %s227_s28 = scalar_lea.hbm %s327_s4, 128 }
  0x74   :  { %p228_p1 = scmp.ne.s32.totalorder %s327_s4, %s227_s28  ;;  %p231_p2 = scmp.lt.u32.totalorder %s227_s28, %s327_s4 }
  0x76   :  { %p233_p3 = pnand %p231_p2, %p228_p1 }
  0x78   :  { %236 = shalt.err (!%p233_p3)
}
  0x79   :  { %125 = dma.vmem_to_hbm [thread:$0]  %s123_s3, 128, %s327_s4, [#allocation4]  }
  0x7a   :  { %241 = dma.done.wait [#allocation4], 128  }
  0x7b   :  { %242 = vsyncadd [#allocation4], 4294967168 }
  0x7c   :  { %129 = vsyncpa [#allocation3], 1 }
  0x7d   :  { %130 = vsyncpa [#allocation6], 1 }
  0x7e   :  { %131 = vsyncpa [#allocation4], 1 }

</bundles_post_ra>
